<compile_context>
chip_gen: v5e
topology: v5e:2x2
jax: 0.10.0
libtpu: 0.0.40
codegen_flags: <defaults>
</compile_context>

<pallas_src>
import jax
import jax.numpy as jnp
from jax.experimental import pallas as pl
from jax.experimental.pallas import tpu as pltpu


def _round_up(x, m):
    return (x + m - 1) // m * m


def _cdiv(a, b):
    return (a + b - 1) // b


def _vla_encoder_kernel(vf_ref, lf_ref, wv_ref, wl_ref, b_ref, out_ref):
    """out = vf @ Wv' + lf @ Wl' + b'   (folded vision_proj/lang_proj/fuse)."""
    cdt = wv_ref.dtype
    acc = jnp.dot(vf_ref[...].astype(cdt), wv_ref[...],
                  preferred_element_type=jnp.float32)
    acc = acc + jnp.dot(lf_ref[...].astype(cdt), wl_ref[...],
                        preferred_element_type=jnp.float32)
    out_ref[...] = (acc + b_ref[...]).astype(out_ref.dtype)


def prepare_params(params, compute_dtype=jnp.bfloat16):
    """One-time host-side folding of the three Linear layers.

    params: PyTorch-convention weights
        wv [H, Dv], bv [H], wl [H, Dl], bl [H], wf [H, 2H], bf [H]
    Only the hidden (output-column) dim is padded to a multiple of 128 so the
    output store is lane-dense; input dims keep their true sizes so the raw
    activations can be fed straight to the kernel (no pad/cast pass).
    """
    wv = params["wv"].astype(jnp.float32)
    bv = params["bv"].astype(jnp.float32)
    wl = params["wl"].astype(jnp.float32)
    bl = params["bl"].astype(jnp.float32)
    wf = params["wf"].astype(jnp.float32)
    bf = params["bf"].astype(jnp.float32)

    H, Dv = wv.shape
    _, Dl = wl.shape
    wf_v_t = wf[:, :H].T                      # [H, H]  vision half of fuse
    wf_l_t = wf[:, H:].T                      # [H, H]  language half of fuse

    wv_f = wv.T @ wf_v_t                      # [Dv, H]
    wl_f = wl.T @ wf_l_t                      # [Dl, H]
    b_f = bf + bv @ wf_v_t + bl @ wf_l_t      # [H]

    Hp = _round_up(H, 128)
    wv_f = jnp.pad(wv_f, ((0, 0), (0, Hp - H))).astype(compute_dtype)
    wl_f = jnp.pad(wl_f, ((0, 0), (0, Hp - H))).astype(compute_dtype)
    b_f = jnp.pad(b_f, (0, Hp - H)).reshape(1, Hp).astype(jnp.float32)

    return {"wv": wv_f, "wl": wl_f, "b": b_f,
            "H": H, "Dv": Dv, "Dl": Dl, "Hp": Hp}


def _vmem_capacity_bytes():
    try:
        return int(pltpu.get_tpu_info().vmem_capacity_bytes)
    except Exception:
        return 64 << 20                        # v7x (smallest current VMEM)


def _vmem_estimate(tb, tn, dv, dl, hp, act_isz, w_isz, out_isz, resident):
    acts = 2 * tb * (dv + dl) * act_isz        # double-buffered activation tiles
    outs = 2 * tb * tn * out_isz               # double-buffered output tiles
    acc = tb * tn * 4                          # f32 accumulator temporary
    if resident:
        wts = (dv + dl) * hp * w_isz + hp * 4  # whole weights + bias, 1 buffer
    else:
        wts = 2 * ((dv + dl) * tn * w_isz + tn * 4)   # streamed weight/bias tiles
    return acts + outs + acc + wts + (1 << 20)        # slack for Mosaic internals


def vla_encoder_forward(vision_feat, lang_feat, prep, *, out_dtype=jnp.float32):
    """VLAEncoder forward. vision_feat [B, Dv], lang_feat [B, Dl] -> [B, H]."""
    B = vision_feat.shape[0]
    H, Dv, Dl, Hp = prep["H"], prep["Dv"], prep["Dl"], prep["Hp"]
    wv, wl, b = prep["wv"], prep["wl"], prep["b"]

    act_isz = jnp.dtype(vision_feat.dtype).itemsize
    w_isz = jnp.dtype(wv.dtype).itemsize
    out_isz = jnp.dtype(out_dtype).itemsize

    budget = int(0.8 * _vmem_capacity_bytes())

    # Batch tile: aim for >= 4 grid steps, multiple of 16 sublanes, cap 512.
    if B <= 16:
        tb0 = B
    else:
        tb0 = min(512, _round_up(_cdiv(B, 4), 16), _round_up(B, 16))

    def fits_resident(tb):
        return _vmem_estimate(tb, Hp, Dv, Dl, Hp, act_isz, w_isz, out_isz,
                              True) <= budget

    tb = tb0
    while tb > 64 and not fits_resident(tb):
        tb = max(64, tb // 2)
    resident = fits_resident(tb)

    if resident:
        est = _vmem_estimate(tb, Hp, Dv, Dl, Hp, act_isz, w_isz, out_isz, True)
        grid = (_cdiv(B, tb),)
        in_specs = [
            pl.BlockSpec((tb, Dv), lambda i: (i, 0)),   # vision tile (pipelined)
            pl.BlockSpec((tb, Dl), lambda i: (i, 0)),   # language tile (pipelined)
            pl.BlockSpec(memory_space=pltpu.MemorySpace.VMEM),  # Wv' resident
            pl.BlockSpec(memory_space=pltpu.MemorySpace.VMEM),  # Wl' resident
            pl.BlockSpec(memory_space=pltpu.MemorySpace.VMEM),  # b'  resident
        ]
        out_spec = pl.BlockSpec((tb, Hp), lambda i: (i, 0))
        dim_sem = ("parallel",)
    else:
        # Folded weights do not fit VMEM (e.g. large H on v7x's 64 MiB):
        # stream weight column tiles along a second grid axis.
        tb = tb0
        tn = Hp
        while True:
            if _vmem_estimate(tb, tn, Dv, Dl, Hp, act_isz, w_isz, out_isz,
                              False) <= budget:
                break
            if tn > 128:
                tn = max(128, _round_up(tn // 2, 128))
            elif tb > 16:
                tb = max(16, tb // 2)
            else:
                break
        est = _vmem_estimate(tb, tn, Dv, Dl, Hp, act_isz, w_isz, out_isz, False)
        grid_b, grid_n = _cdiv(B, tb), _cdiv(Hp, tn)

        # Order the grid so the larger operand set is read from HBM only once.
        weights_outer = (Dv + Dl) * Hp * w_isz >= B * (Dv + Dl) * act_isz
        if weights_outer:                  # weights read once, acts re-read
            grid = (grid_n, grid_b)
            bi = lambda j, i: i
            nj = lambda j, i: j
        else:                              # acts read once, weights re-read
            grid = (grid_b, grid_n)
            bi = lambda i, j: i
            nj = lambda i, j: j
        in_specs = [
            pl.BlockSpec((tb, Dv), lambda *g: (bi(*g), 0)),
            pl.BlockSpec((tb, Dl), lambda *g: (bi(*g), 0)),
            pl.BlockSpec((Dv, tn), lambda *g: (0, nj(*g))),
            pl.BlockSpec((Dl, tn), lambda *g: (0, nj(*g))),
            pl.BlockSpec((1, tn), lambda *g: (0, nj(*g))),
        ]
        out_spec = pl.BlockSpec((tb, tn), lambda *g: (bi(*g), nj(*g)))
        dim_sem = ("parallel", "parallel")

    vmem_limit = None
    if est > (14 << 20):                   # exceeds v5e's 16 MiB default scope
        vmem_limit = min(int(est * 1.25), budget)

    out = pl.pallas_call(
        _vla_encoder_kernel,
        out_shape=jax.ShapeDtypeStruct((B, Hp), out_dtype),
        grid=grid,
        in_specs=in_specs,
        out_specs=out_spec,
        compiler_params=pltpu.CompilerParams(
            dimension_semantics=dim_sem,
            vmem_limit_bytes=vmem_limit),
    )(vision_feat, lang_feat, wv, wl, b)

    # Trailing slice only when the hidden dim was actually padded.
    return out if Hp == H else out[:, :H]


def init_params(key, vision_dim, lang_dim, hidden_dim):
    """Deterministic init mimicking nn.Linear (uniform +/- 1/sqrt(fan_in))."""
    ks = jax.random.split(key, 6)

    def lin(kw, kb, out_f, in_f):
        bound = 1.0 / jnp.sqrt(jnp.float32(in_f))
        w = jax.random.uniform(kw, (out_f, in_f), jnp.float32, -bound, bound)
        b = jax.random.uniform(kb, (out_f,), jnp.float32, -bound, bound)
        return w, b

    wv, bv = lin(ks[0], ks[1], hidden_dim, vision_dim)
    wl, bl = lin(ks[2], ks[3], hidden_dim, lang_dim)
    wf, bf = lin(ks[4], ks[5], hidden_dim, 2 * hidden_dim)
    return {"wv": wv, "bv": bv, "wl": wl, "bl": bl, "wf": wf, "bf": bf}


def reference_forward(vision_feat, lang_feat, params):
    """Pure-JAX reference matching the PyTorch forward exactly (unfused)."""
    v = vision_feat @ params["wv"].T + params["bv"]
    l = lang_feat @ params["wl"].T + params["bl"]
    cat = jnp.concatenate([v, l], axis=-1)
    return cat @ params["wf"].T + params["bf"]


if __name__ == "__main__":
    # NOTE: toy sizes for correctness only; perf decisions (tile sizes, dtype)
    # must be validated at real VLA sizes, not here.
    B, VISION_DIM, LANG_DIM, HIDDEN_DIM = 8, 32, 16, 32

    key = jax.random.PRNGKey(0)
    k_v, k_l, k_p = jax.random.split(key, 3)

    vision_feat = jax.random.normal(k_v, (B, VISION_DIM), jnp.float32)
    lang_feat = jax.random.normal(k_l, (B, LANG_DIM), jnp.float32)
    params = init_params(k_p, VISION_DIM, LANG_DIM, HIDDEN_DIM)

    ref = reference_forward(vision_feat, lang_feat, params)

    # f32 compute path: exact up to fp reordering from the algebraic fold.
    prep_f32 = prepare_params(params, jnp.float32)
    out_f32 = jax.block_until_ready(
        vla_encoder_forward(vision_feat, lang_feat, prep_f32))
    assert out_f32.shape == (B, HIDDEN_DIM)
    assert jnp.allclose(out_f32, ref, atol=1e-4, rtol=1e-4), "f32 mismatch"

    # Default bf16 compute path: bf16 MXU operands, f32 accumulation/bias.
    prep_bf16 = prepare_params(params)          # compute_dtype=bfloat16 default
    out_bf16 = jax.block_until_ready(
        vla_encoder_forward(vision_feat, lang_feat, prep_bf16))
    assert out_bf16.shape == (B, HIDDEN_DIM)
    assert jnp.allclose(out_bf16, ref, atol=1e-1, rtol=1e-1), "bf16 mismatch"

    print("KERNEL_OK")
</pallas_src>

<mosaic_0001>
module attributes {stable_mosaic.version = 11 : i64} {
  func.func @_vla_encoder_kernel(%arg0: i32, %arg1: memref<8x32xf32, #tpu.memory_space<vmem>>, %arg2: memref<8x16xf32, #tpu.memory_space<vmem>>, %arg3: memref<32x128xf32, #tpu.memory_space<vmem>>, %arg4: memref<16x128xf32, #tpu.memory_space<vmem>>, %arg5: memref<1x128xf32, #tpu.memory_space<vmem>>, %arg6: memref<8x128xf32, #tpu.memory_space<vmem>>) attributes {dimension_semantics = [#tpu.dimension_semantics<parallel>], iteration_bounds = array<i64: 1>, scalar_prefetch = 0 : i64, scratch_operands = 0 : i64, tpu.core_type = #tpu.core_type<tc>, window_params = [{transform_indices = @transform_0, window_bounds = array<i64: 8, 32>}, {transform_indices = @transform_1, window_bounds = array<i64: 8, 16>}, {pipeline_mode = #tpu.pipeline_mode<synchronous>, transform_indices = @transform_2, window_bounds = array<i64: 32, 128>}, {pipeline_mode = #tpu.pipeline_mode<synchronous>, transform_indices = @transform_3, window_bounds = array<i64: 16, 128>}, {pipeline_mode = #tpu.pipeline_mode<synchronous>, transform_indices = @transform_4, window_bounds = array<i64: 1, 128>}, {transform_indices = @transform_5, window_bounds = array<i64: 8, 128>}]} {
    %c0 = arith.constant 0 : index
    %c0_0 = arith.constant 0 : index
    %0 = vector.load %arg1[%c0, %c0_0] : memref<8x32xf32, #tpu.memory_space<vmem>>, vector<8x32xf32>
    %c0_1 = arith.constant 0 : index
    %c0_2 = arith.constant 0 : index
    %1 = vector.load %arg3[%c0_1, %c0_2] : memref<32x128xf32, #tpu.memory_space<vmem>>, vector<32x128xf32>
    %cst = arith.constant dense<0.000000e+00> : vector<8x128xf32>
    %2 = tpu.matmul %0, %1, %cst {dimension_numbers = #tpu.dot_dimension_numbers<[1], [0], [0], [1], [0, 0, 1, 1], [], []>} : vector<8x32xf32>, vector<32x128xf32>, vector<8x128xf32> -> vector<8x128xf32>
    %c0_3 = arith.constant 0 : index
    %c0_4 = arith.constant 0 : index
    %3 = vector.load %arg2[%c0_3, %c0_4] : memref<8x16xf32, #tpu.memory_space<vmem>>, vector<8x16xf32>
    %c0_5 = arith.constant 0 : index
    %c0_6 = arith.constant 0 : index
    %4 = vector.load %arg4[%c0_5, %c0_6] : memref<16x128xf32, #tpu.memory_space<vmem>>, vector<16x128xf32>
    %cst_7 = arith.constant dense<0.000000e+00> : vector<8x128xf32>
    %5 = tpu.matmul %3, %4, %cst_7 {dimension_numbers = #tpu.dot_dimension_numbers<[1], [0], [0], [1], [0, 0, 1, 1], [], []>} : vector<8x16xf32>, vector<16x128xf32>, vector<8x128xf32> -> vector<8x128xf32>
    %6 = arith.addf %2, %5 : vector<8x128xf32>
    %c0_8 = arith.constant 0 : index
    %c0_9 = arith.constant 0 : index
    %7 = vector.load %arg5[%c0_8, %c0_9] : memref<1x128xf32, #tpu.memory_space<vmem>>, vector<1x128xf32>
    %8 = vector.broadcast %7 : vector<1x128xf32> to vector<8x128xf32>
    %9 = arith.addf %6, %8 : vector<8x128xf32>
    %c0_10 = arith.constant 0 : index
    %c0_11 = arith.constant 0 : index
    %10 = vector.load %arg6[%c0_10, %c0_11] : memref<8x128xf32, #tpu.memory_space<vmem>>, vector<8x128xf32>
    tpu.vector_store %arg6[%c0_10, %c0_11], %9 {strides = array<i32>} : memref<8x128xf32, #tpu.memory_space<vmem>>, vector<8x128xf32>,
    return
  }
  func.func @transform_0(%arg0: i32) -> (i32, i32) {
    %c0_i32 = arith.constant 0 : i32
    %c0_i32_0 = arith.constant 0 : i32
    return %arg0, %c0_i32 : i32, i32
  }
  func.func @transform_1(%arg0: i32) -> (i32, i32) {
    %c0_i32 = arith.constant 0 : i32
    %c0_i32_0 = arith.constant 0 : i32
    return %arg0, %c0_i32 : i32, i32
  }
  func.func @transform_2(%arg0: i32) -> (i32, i32) {
    %c0_i32 = arith.constant 0 : i32
    %c0_i32_0 = arith.constant 0 : i32
    %c0_i32_1 = arith.constant 0 : i32
    return %c0_i32, %c0_i32_0 : i32, i32
  }
  func.func @transform_3(%arg0: i32) -> (i32, i32) {
    %c0_i32 = arith.constant 0 : i32
    %c0_i32_0 = arith.constant 0 : i32
    %c0_i32_1 = arith.constant 0 : i32
    return %c0_i32, %c0_i32_0 : i32, i32
  }
  func.func @transform_4(%arg0: i32) -> (i32, i32) {
    %c0_i32 = arith.constant 0 : i32
    %c0_i32_0 = arith.constant 0 : i32
    %c0_i32_1 = arith.constant 0 : i32
    return %c0_i32, %c0_i32_0 : i32, i32
  }
  func.func @transform_5(%arg0: i32) -> (i32, i32) {
    %c0_i32 = arith.constant 0 : i32
    %c0_i32_0 = arith.constant 0 : i32
    return %arg0, %c0_i32 : i32, i32
  }
}

</mosaic_0001>

<bundles_post_ra>
// kernel: tpu_custom_call.1
= control target key start
LH: loop header
LB: loop body
LE: loop exit
PB: predicated region body
PF: predicated region fallthrough
CT: control target
= control target key end

     0   :  { %10 = vsyncpa [#allocation3], 0  ;;  %s354_s0 = inlined_call_operand.hbm [shape: f32[8,32], index: 0, kind: input, shape index: {}]   ;;  %s355_s1 = inlined_call_operand.hbm [shape: f32[8,16], index: 1, kind: input, shape index: {}]   ;;  %s356_s2 = inlined_call_operand.hbm [shape: f32[32,128], index: 2, kind: input, shape index: {}]   ;;  %s357_s3 = inlined_call_operand.hbm [shape: f32[16,128], index: 3, kind: input, shape index: {}]   ;;  %s358_s4 = inlined_call_operand.vmem [shape: f32[1,128], index: 4, kind: input, shape index: {}]   ;;  %s359_s5 = inlined_call_operand.hbm [shape: f32[8,128], index: 5, kind: output, shape index: {}]  }
   0x1   :  { %11 = vsyncpa [#allocation6], 0 }
   0x2   :  { %12 = vsyncpa [#allocation9], 0  ;;  %s30_s20 = sshll.u32 %s355_s1, 4  ;;  %s31_s20 = int_to_ptr.hbm [resolvable:$true] %s30_s20 }
   0x3   :  { %13 = vsyncpa [#allocation4], 0  ;;  %s299_s21 = smov [#allocation5]   ;;  %s19_s25 = sshll.u32 %s354_s0, 4  ;;  %s20_s25 = int_to_ptr.hbm [resolvable:$true] %s19_s25 }
   0x4   :  { %s32_s22 = sshll.u32 %s299_s21, 4  ;;  %s300_s26 = smov [#allocation2]   ;;  %s33_s22 = int_to_ptr.vmem [resolvable:$true] %s32_s22 }
   0x5   :  { %35 = dma.hbm_to_vmem [thread:$0]  %s31_s20, 128, %s33_s22, [#allocation6]  }
   0x6   :  { %s21_s27 = sshll.u32 %s300_s26, 4  ;;  %s40_s30 = sshll.u32 %s356_s2, 4  ;;  %s22_s27 = int_to_ptr.vmem [resolvable:$true] %s21_s27  ;;  %s41_s30 = int_to_ptr.hbm [resolvable:$true] %s40_s30 }
   0x7   :  { %24 = dma.hbm_to_vmem [thread:$0]  %s20_s25, 128, %s22_s27, [#allocation3]  }
   0x8   :  { %s301_s1 = smov [#allocation7]   ;;  %s53_s9 = sshll.u32 %s357_s3, 4  ;;  %s54_s9 = int_to_ptr.hbm [resolvable:$true] %s53_s9 }
   0x9   :  { %s42_s6 = sshll.u32 %s301_s1, 4  ;;  %s302_s10 = smov 128   ;;  %s43_s6 = int_to_ptr.vmem [resolvable:$true] %s42_s6 }
   0xa   :  { %s303_s0 = smov 8   ;;  %s304_s11 = smov [#allocation8]  }
   0xb   :  { %48 = dma.hbm_to_vmem [thread:$0]  %s41_s30, 512, %s43_s6, [#allocation6], %s302_s10, %s302_s10, %s303_s0  }
   0xc   :  { %s55_s12 = sshll.u32 %s304_s11, 4  ;;  %s56_s12 = int_to_ptr.vmem [resolvable:$true] %s55_s12 }
   0xd   :  { %61 = dma.hbm_to_vmem [thread:$0]  %s54_s9, 256, %s56_s12, [#allocation9], %s302_s10, %s302_s10, %s303_s0  }
   0xe   :  { %291 = dma.done.wait [#allocation3], 128  }
   0xf   :  { %292 = vsyncadd [#allocation3], 4294967168 }
  0x10   :  { %293 = dma.done.wait [#allocation6], 640  }
  0x11   :  { %294 = vsyncadd [#allocation6], 4294966656 }
  0x12   :  { %295 = dma.done.wait [#allocation9], 256  }
  0x13   :  { %296 = vsyncadd [#allocation9], 4294967040  ;;  %v84_v0 = vld [vmem:[#allocation7 + $0x18] sm:$0xff]  ;;  %v83_v1 = vld [vmem:[#allocation7 + $0x10] sm:$0xff]  ;;  %vm88_vm0 = vcmask 130048   ;;  %vm112_vm1 = vcmask 261120  }
  0x14   :  { %v87_v2 = vld [vmem:[#allocation8 + $0x8] sm:$0xff]  ;;  %128 = vmatpush.msra.mxu1 %v84_v0  ;;  %v86_v3 = vld [vmem:[#allocation8] sm:$0xff]  ;;  %v85_v5 = vld [vmem:[#allocation5] sm:$0xff]  ;;  %s305_s13 = smov [#allocation10]   ;;  %s149_s17 = sshll.u32 %s359_s5, 4  ;;  %s150_s17 = int_to_ptr.hbm [resolvable:$true] %s149_s17 }
  0x15   :  { %106 = vmatpush.msra.mxu0 %v87_v2  ;;  %v82_v4 = vld [vmem:[#allocation7 + $0x8] sm:$0xff]  ;;  %v81_v6 = vld [vmem:[#allocation7] sm:$0xff]  ;;  %v80_v7 = vld [vmem:[#allocation2] sm:$0xff]  ;;  %s147_s14 = sshll.u32 %s305_s13, 4  ;;  %s148_s14 = int_to_ptr.vmem [resolvable:$true] %s147_s14 }
  0x16   :  { %129 = vmatpush.msra.mxu1 %v83_v1  ;;  %v170_v9 = vld [vmem:[%s358_s4] ss:$0 sm:$0xff] }
  0x17   :  { %107 = vmatpush.msra.mxu0 %v86_v3 }
  0x18   :  { %161 = vmatmul.msk.f32.vlgmr.msra.gmra.mxu0 %vm88_vm0, %v85_v5  ;;  %130 = vmatpush.msra.mxu1 %v82_v4 }
  0x1a   :  { %131 = vmatpush.msra.mxu1 %v81_v6 }
  0x1b   :  { %162 = vmatmul.msk.f32.vlgmr.msra.gmra.mxu1 %vm112_vm1, %v80_v7 }
  0x95   :  { %v109_v8 = vpop.f32.mrf.mxu0 }
  0x98   :  { %v133_v10 = vpop.f32.mrf.mxu1 }
  0x99   :  { %v134_v11 = vadd.f32 %v133_v10, %v109_v8 }
  0x9b   :  { %v140_v12 = vadd.f32 %v170_v9, %v134_v11 }
  0x9d   :  { %141 = vst [vmem:[#allocation10] sm:$0xff] %v140_v12 }
  0x9e   :  { %152 = dma.vmem_to_hbm [thread:$0]  %s148_s14, 128, %s150_s17, [#allocation4]  }
  0x9f   :  { %297 = dma.done.wait [#allocation4], 128  }
  0xa0   :  { %298 = vsyncadd [#allocation4], 4294967168 }
  0xa1   :  { %157 = vsyncpa [#allocation3], 1 }
  0xa2   :  { %158 = vsyncpa [#allocation6], 1 }
  0xa3   :  { %159 = vsyncpa [#allocation9], 1 }
  0xa4   :  { %160 = vsyncpa [#allocation4], 1 }

</bundles_post_ra>
